<compile_context>
chip_gen: v7x
topology: tpu7x:2x2x1
jax: 0.10.0
libtpu: 0.0.40
codegen_flags: <defaults>
</compile_context>

<pallas_src>
import functools

import jax
import jax.numpy as jnp
from jax.experimental import pallas as pl
from jax.experimental.pallas import tpu as pltpu


VMEM_BUDGET_BYTES = 32 * 1024 * 1024   # working-set target (leaves headroom on v7x 64 MiB)
VMEM_LIMIT_BYTES = 48 * 1024 * 1024    # scoped VMEM limit handed to the compiler


def _round_up(x, m):
    return (x + m - 1) // m * m


def _choose_seq_chunk(sp, target_rows=256):
    """Largest multiple of 8 <= target_rows that divides sp (sp is a multiple of 8)."""
    c = min(sp, max(8, (target_rows // 8) * 8))
    while c > 8 and sp % c != 0:
        c -= 8
    return max(c, 8)


def _choose_block_b(batch, s_chunk, v, hp,
                    vmem_budget=VMEM_BUDGET_BYTES, target_rows=1024):
    """Batch tile so block_b * s_chunk ~ target_rows, bounded by the VMEM budget."""
    bb = max(8, (target_rows // max(s_chunk, 1)) // 8 * 8)
    bb = min(bb, _round_up(batch, 8))

    def vmem_est(b):
        x_in = 2 * 2 * b * s_chunk * v * 4               # two f32 inputs, double-buffered
        wts = 2 * (v * hp * 2 + (2 * hp * hp + hp * 128 + 2 * hp) * 4)
        acc = 2 * b * hp * 4                             # f32 accumulators
        interm = 2 * b * s_chunk * hp * 4                # live f32 hidden chunk (bound)
        out = 2 * b * 128 * 4
        return x_in + wts + acc + interm + out

    while bb > 8 and vmem_est(bb) > vmem_budget:
        bb -= 8

    # Prefer an even number of batch tiles so v7x's two TensorCores split evenly.
    nb = -(-batch // bb)
    if nb > 1 and nb % 2 == 1 and bb % 16 == 0:
        bb //= 2
    return bb


def preprocess_params(params):
    """One-time padding / casting of the parameters (hoist out of the hot path).

    Zero-padding preserves the math exactly: extra hidden cols give relu(0)=0,
    extra fd rows/cols contribute 0, extra logit cols are discarded by the wrapper.
    """
    w_mlp, b_mlp, w_fd, b_fd, w_ff, b_ff = params
    v, h = w_mlp.shape
    hp = _round_up(h, 128)     # lane-dense hidden width
    op = 128                   # lane-dense logit width (column 0 is the real logit)
    return dict(
        w_mlp=jnp.pad(w_mlp, ((0, 0), (0, hp - h))).astype(jnp.bfloat16),
        b_mlp=jnp.pad(b_mlp.reshape(1, h), ((0, 0), (0, hp - h))).astype(jnp.float32),
        w_fd1=jnp.pad(w_fd[:h], ((0, hp - h), (0, hp - h))).astype(jnp.float32),
        w_fd2=jnp.pad(w_fd[h:], ((0, hp - h), (0, hp - h))).astype(jnp.float32),
        b_fd=jnp.pad(b_fd.reshape(1, h), ((0, 0), (0, hp - h))).astype(jnp.float32),
        w_ff=jnp.pad(w_ff, ((0, hp - h), (0, op - 1))).astype(jnp.float32),
        b_ff=jnp.asarray(b_ff, jnp.float32).reshape(1, 1),
        V=v, H=h, HP=hp, OP=op,
    )


def bert_cls_av_kernel(x1_ref, x2_ref,
                       w_mlp_ref, b_mlp_ref,
                       w_fd1_ref, w_fd2_ref, b_fd_ref,
                       w_ff_ref, b_ff_ref,
                       out_ref,
                       acc1_ref, acc2_ref,
                       *, s1, s2, n_pad1, n_pad2):
    s_idx = pl.program_id(1)

    @pl.when(s_idx == 0)
    def _():
        acc1_ref[...] = jnp.zeros_like(acc1_ref)
        acc2_ref[...] = jnp.zeros_like(acc2_ref)

    tb, sc, v = x1_ref.shape
    hp = w_mlp_ref.shape[1]

    w_mlp = w_mlp_ref[...]                 # (V, HP)  bf16
    b_mlp = b_mlp_ref[...]                 # (1, HP)  f32

    # Shared mlp + ReLU on this sequence chunk: flat 2D bf16 MXU matmul, f32 acc.
    # Cast to bf16 happens here (inputs arrive as f32 straight from HBM).
    x1 = x1_ref[...].reshape(tb * sc, v).astype(jnp.bfloat16)
    h1 = jnp.maximum(
        jnp.dot(x1, w_mlp, preferred_element_type=jnp.float32) + b_mlp, 0.0)
    acc1_ref[...] += jnp.sum(h1.reshape(tb, sc, hp), axis=1)

    x2 = x2_ref[...].reshape(tb * sc, v).astype(jnp.bfloat16)
    h2 = jnp.maximum(
        jnp.dot(x2, w_mlp, preferred_element_type=jnp.float32) + b_mlp, 0.0)
    acc2_ref[...] += jnp.sum(h2.reshape(tb, sc, hp), axis=1)

    @pl.when(s_idx == pl.num_programs(1) - 1)
    def _():
        # Each zero-padded sequence row contributed exactly relu(b_mlp) to the sum;
        # subtract that analytically, then divide by the true sequence length.
        relu_b = jnp.maximum(b_mlp, 0.0)
        m1 = (acc1_ref[...] - float(n_pad1) * relu_b) * (1.0 / float(s1))
        m2 = (acc2_ref[...] - float(n_pad2) * relu_b) * (1.0 / float(s2))

        # fd layer: concat([m1, m2]) @ W_fd  ==  m1 @ W_fd[:H] + m2 @ W_fd[H:]
        # Tiny matmuls -> keep the whole epilogue in f32 for precision.
        fd = jnp.maximum(
            jnp.dot(m1, w_fd1_ref[...], preferred_element_type=jnp.float32)
            + jnp.dot(m2, w_fd2_ref[...], preferred_element_type=jnp.float32)
            + b_fd_ref[...], 0.0)

        # ff layer (logit lane-padded to 128; real logit lives in column 0) + sigmoid.
        logit = (jnp.dot(fd, w_ff_ref[...], preferred_element_type=jnp.float32)
                 + b_ff_ref[0, 0])
        out_ref[...] = jax.nn.sigmoid(logit)   # (tb, 128) f32 lane-dense store


def bert_cls_av_forward(x1, x2, prepped):
    """Training-mode forward. x1: (B,S1,V), x2: (B,S2,V). Returns (B,) f32."""
    B, S1, V = x1.shape
    S2 = x2.shape[1]
    assert V == prepped["V"]
    HP, OP = prepped["HP"], prepped["OP"]

    # Sequence padding: common multiple-of-8 length so the in-kernel reshape is a
    # free sublane relabel; chunk the seq axis for the running-mean reduction.
    Sp = _round_up(max(S1, S2), 8)
    s_chunk = _choose_seq_chunk(Sp)
    ns = Sp // s_chunk

    # Batch padding: always tile (never a single full-batch block).
    block_b = _choose_block_b(B, s_chunk, V, HP)
    BP = _round_up(B, block_b)
    nb = BP // block_b

    x1p = x1.astype(jnp.float32)
    x2p = x2.astype(jnp.float32)
    if (BP, Sp) != (B, S1):
        x1p = jnp.pad(x1p, ((0, BP - B), (0, Sp - S1), (0, 0)))
    if (BP, Sp) != (B, S2):
        x2p = jnp.pad(x2p, ((0, BP - B), (0, Sp - S2), (0, 0)))

    kernel = functools.partial(
        bert_cls_av_kernel,
        s1=S1, s2=S2, n_pad1=Sp - S1, n_pad2=Sp - S2)

    bcast = lambda b, s: (0, 0)
    out_padded = pl.pallas_call(
        kernel,
        out_shape=jax.ShapeDtypeStruct((BP, OP), jnp.float32),
        grid=(nb, ns),
        in_specs=[
            pl.BlockSpec((block_b, s_chunk, V), lambda b, s: (b, s, 0)),
            pl.BlockSpec((block_b, s_chunk, V), lambda b, s: (b, s, 0)),
            pl.BlockSpec((V, HP), bcast),      # constant index -> stays resident
            pl.BlockSpec((1, HP), bcast),
            pl.BlockSpec((HP, HP), bcast),
            pl.BlockSpec((HP, HP), bcast),
            pl.BlockSpec((1, HP), bcast),
            pl.BlockSpec((HP, OP), bcast),
            pl.BlockSpec(memory_space=pltpu.MemorySpace.SMEM),   # scalar b_ff
        ],
        out_specs=pl.BlockSpec((block_b, OP), lambda b, s: (b, 0)),
        scratch_shapes=[pltpu.VMEM((block_b, HP), jnp.float32),
                        pltpu.VMEM((block_b, HP), jnp.float32)],
        compiler_params=pltpu.CompilerParams(
            dimension_semantics=("parallel", "arbitrary"),
            vmem_limit_bytes=VMEM_LIMIT_BYTES),
    )(x1p, x2p,
      prepped["w_mlp"], prepped["b_mlp"],
      prepped["w_fd1"], prepped["w_fd2"], prepped["b_fd"],
      prepped["w_ff"], prepped["b_ff"])

    # torch.squeeze on (B, 1) -> (B,); column 0 of the lane-padded logit, drop batch pad.
    return out_padded[:B, 0]


def _reference(x1, x2, params):
    """Pure-JAX f32 reference of the PyTorch training branch."""
    w_mlp, b_mlp, w_fd, b_fd, w_ff, b_ff = params
    h1 = jnp.maximum(x1 @ w_mlp + b_mlp, 0.0)
    h2 = jnp.maximum(x2 @ w_mlp + b_mlp, 0.0)
    m1 = jnp.mean(h1, axis=1)
    m2 = jnp.mean(h2, axis=1)
    cat = jnp.concatenate([m1, m2], axis=1)
    fd = jnp.maximum(cat @ w_fd + b_fd, 0.0)
    logit = fd @ w_ff + b_ff
    return jax.nn.sigmoid(jnp.squeeze(logit, axis=-1))


if __name__ == "__main__":
    # Small shapes: vector_size=32, sent_hidden_size=16.
    V, H = 32, 16

    key = jax.random.PRNGKey(0)
    ks = jax.random.split(key, 10)

    # Deterministic synthetic parameters (nn.Linear shapes, stored transposed).
    w_mlp = 0.1 * jax.random.normal(ks[2], (V, H), jnp.float32)     # mlp: Linear(V, H)
    b_mlp = 0.1 * jax.random.normal(ks[3], (1, H), jnp.float32)
    w_fd = 0.1 * jax.random.normal(ks[4], (2 * H, H), jnp.float32)  # fd: Linear(2H, H)
    b_fd = 0.1 * jax.random.normal(ks[5], (1, H), jnp.float32)
    w_ff = 0.1 * jax.random.normal(ks[6], (H, 1), jnp.float32)      # ff: Linear(H, 1)
    b_ff = 0.1 * jax.random.normal(ks[7], (1, 1), jnp.float32)
    params = (w_mlp, b_mlp, w_fd, b_fd, w_ff, b_ff)

    # One-time parameter preprocessing (hoisted out of the per-call forward).
    prepped = jax.tree.map(jax.block_until_ready,
                           {k: v for k, v in preprocess_params(params).items()
                            if not isinstance(v, int)})
    prepped.update({k: v for k, v in preprocess_params(params).items()
                    if isinstance(v, int)})

    # Case 1: aligned shapes (batch=2, seq=8).
    x1 = jax.random.normal(ks[0], (2, 8, V), jnp.float32)
    x2 = jax.random.normal(ks[1], (2, 8, V), jnp.float32)
    out = jax.block_until_ready(bert_cls_av_forward(x1, x2, prepped))
    ref = _reference(x1, x2, params)
    assert out.shape == (2,), out.shape
    assert jnp.allclose(out, ref, atol=1e-2, rtol=1e-2), (out, ref)

    # Case 2: ragged shapes exercising batch padding, seq padding and the
    # relu(b_mlp) padding correction (batch=3, seq1=8, seq2=16).
    x1 = jax.random.normal(ks[8], (3, 8, V), jnp.float32)
    x2 = jax.random.normal(ks[9], (3, 16, V), jnp.float32)
    out = jax.block_until_ready(bert_cls_av_forward(x1, x2, prepped))
    ref = _reference(x1, x2, params)
    assert out.shape == (3,), out.shape
    assert jnp.allclose(out, ref, atol=1e-2, rtol=1e-2), (out, ref)

    print("KERNEL_OK")
</pallas_src>

<mosaic_0001>
module attributes {stable_mosaic.version = 11 : i64} {
  func.func @bert_cls_av_kernel(%arg0: i32, %arg1: i32, %arg2: memref<8x8x32xf32, #tpu.memory_space<vmem>>, %arg3: memref<8x8x32xf32, #tpu.memory_space<vmem>>, %arg4: memref<32x128xbf16, #tpu.memory_space<vmem>>, %arg5: memref<1x128xf32, #tpu.memory_space<vmem>>, %arg6: memref<128x128xf32, #tpu.memory_space<vmem>>, %arg7: memref<128x128xf32, #tpu.memory_space<vmem>>, %arg8: memref<1x128xf32, #tpu.memory_space<vmem>>, %arg9: memref<128x128xf32, #tpu.memory_space<vmem>>, %arg10: memref<1x1xf32, #tpu.memory_space<smem>>, %arg11: memref<8x128xf32, #tpu.memory_space<vmem>>, %arg12: memref<8x128xf32, #tpu.memory_space<vmem>>, %arg13: memref<8x128xf32, #tpu.memory_space<vmem>>) attributes {dimension_semantics = [#tpu.dimension_semantics<parallel>, #tpu.dimension_semantics<arbitrary>], iteration_bounds = array<i64: 1, 1>, scalar_prefetch = 0 : i64, scratch_operands = 2 : i64, tpu.core_type = #tpu.core_type<tc>, window_params = [{transform_indices = @transform_0, window_bounds = array<i64: 8, 8, 32>}, {transform_indices = @transform_1, window_bounds = array<i64: 8, 8, 32>}, {pipeline_mode = #tpu.pipeline_mode<synchronous>, transform_indices = @transform_2, window_bounds = array<i64: 32, 128>}, {pipeline_mode = #tpu.pipeline_mode<synchronous>, transform_indices = @transform_3, window_bounds = array<i64: 1, 128>}, {pipeline_mode = #tpu.pipeline_mode<synchronous>, transform_indices = @transform_4, window_bounds = array<i64: 128, 128>}, {pipeline_mode = #tpu.pipeline_mode<synchronous>, transform_indices = @transform_5, window_bounds = array<i64: 128, 128>}, {pipeline_mode = #tpu.pipeline_mode<synchronous>, transform_indices = @transform_6, window_bounds = array<i64: 1, 128>}, {pipeline_mode = #tpu.pipeline_mode<synchronous>, transform_indices = @transform_7, window_bounds = array<i64: 128, 128>}, {transform_indices = @transform_8, window_bounds = array<i64: 1, 1>}, {transform_indices = @transform_9, window_bounds = array<i64: 8, 128>}]} {
    %c0_i32 = arith.constant 0 : i32
    %0 = arith.cmpi eq, %arg1, %c0_i32 : i32
    %1 = arith.extui %0 : i1 to i32
    %c0_i32_0 = arith.constant 0 : i32
    %2 = arith.cmpi ne, %1, %c0_i32_0 : i32
    scf.if %2 {
      %cst_25 = arith.constant 0.000000e+00 : f32
      %34 = vector.broadcast %cst_25 : f32 to vector<8x128xf32>
      %c0_26 = arith.constant 0 : index
      %c0_27 = arith.constant 0 : index
      %35 = vector.load %arg12[%c0_26, %c0_27] : memref<8x128xf32, #tpu.memory_space<vmem>>, vector<8x128xf32>
      tpu.vector_store %arg12[%c0_26, %c0_27], %34 {strides = array<i32>} : memref<8x128xf32, #tpu.memory_space<vmem>>, vector<8x128xf32>,
      %cst_28 = arith.constant 0.000000e+00 : f32
      %36 = vector.broadcast %cst_28 : f32 to vector<8x128xf32>
      %c0_29 = arith.constant 0 : index
      %c0_30 = arith.constant 0 : index
      %37 = vector.load %arg13[%c0_29, %c0_30] : memref<8x128xf32, #tpu.memory_space<vmem>>, vector<8x128xf32>
      tpu.vector_store %arg13[%c0_29, %c0_30], %36 {strides = array<i32>} : memref<8x128xf32, #tpu.memory_space<vmem>>, vector<8x128xf32>,
    } else {
    }
    %c0 = arith.constant 0 : index
    %c0_1 = arith.constant 0 : index
    %3 = vector.load %arg4[%c0, %c0_1] : memref<32x128xbf16, #tpu.memory_space<vmem>>, vector<32x128xbf16>
    %c0_2 = arith.constant 0 : index
    %c0_3 = arith.constant 0 : index
    %4 = vector.load %arg5[%c0_2, %c0_3] : memref<1x128xf32, #tpu.memory_space<vmem>>, vector<1x128xf32>
    %c0_4 = arith.constant 0 : index
    %c0_5 = arith.constant 0 : index
    %c0_6 = arith.constant 0 : index
    %5 = vector.load %arg2[%c0_4, %c0_5, %c0_6] : memref<8x8x32xf32, #tpu.memory_space<vmem>>, vector<8x8x32xf32>
    %6 = vector.shape_cast %5 : vector<8x8x32xf32> to vector<64x32xf32>
    %7 = arith.truncf %6 : vector<64x32xf32> to vector<64x32xbf16>
    %cst = arith.constant dense<0.000000e+00> : vector<64x128xf32>
    %8 = tpu.matmul %7, %3, %cst {dimension_numbers = #tpu.dot_dimension_numbers<[1], [0], [0], [1], [0, 0, 1, 1], [], []>} : vector<64x32xbf16>, vector<32x128xbf16>, vector<64x128xf32> -> vector<64x128xf32>
    %9 = vector.broadcast %4 : vector<1x128xf32> to vector<64x128xf32>
    %10 = arith.addf %8, %9 : vector<64x128xf32>
    %cst_7 = arith.constant 0.000000e+00 : f32
    %11 = vector.broadcast %cst_7 : f32 to vector<64x128xf32>
    %12 = arith.maximumf %10, %11 : vector<64x128xf32>
    %c0_8 = arith.constant 0 : index
    %c0_9 = arith.constant 0 : index
    %13 = vector.load %arg12[%c0_8, %c0_9] : memref<8x128xf32, #tpu.memory_space<vmem>>, vector<8x128xf32>
    %14 = vector.shape_cast %12 : vector<64x128xf32> to vector<8x8x128xf32>
    %cst_10 = arith.constant dense<0.000000e+00> : vector<8x128xf32>
    %15 = vector.multi_reduction <add>, %14, %cst_10 [1] : vector<8x8x128xf32> to vector<8x128xf32>
    %16 = arith.addf %13, %15 : vector<8x128xf32>
    %c0_11 = arith.constant 0 : index
    %c0_12 = arith.constant 0 : index
    %17 = vector.load %arg12[%c0_11, %c0_12] : memref<8x128xf32, #tpu.memory_space<vmem>>, vector<8x128xf32>
    tpu.vector_store %arg12[%c0_11, %c0_12], %16 {strides = array<i32>} : memref<8x128xf32, #tpu.memory_space<vmem>>, vector<8x128xf32>,
    %c0_13 = arith.constant 0 : index
    %c0_14 = arith.constant 0 : index
    %c0_15 = arith.constant 0 : index
    %18 = vector.load %arg3[%c0_13, %c0_14, %c0_15] : memref<8x8x32xf32, #tpu.memory_space<vmem>>, vector<8x8x32xf32>
    %19 = vector.shape_cast %18 : vector<8x8x32xf32> to vector<64x32xf32>
    %20 = arith.truncf %19 : vector<64x32xf32> to vector<64x32xbf16>
    %cst_16 = arith.constant dense<0.000000e+00> : vector<64x128xf32>
    %21 = tpu.matmul %20, %3, %cst_16 {dimension_numbers = #tpu.dot_dimension_numbers<[1], [0], [0], [1], [0, 0, 1, 1], [], []>} : vector<64x32xbf16>, vector<32x128xbf16>, vector<64x128xf32> -> vector<64x128xf32>
    %22 = vector.broadcast %4 : vector<1x128xf32> to vector<64x128xf32>
    %23 = arith.addf %21, %22 : vector<64x128xf32>
    %cst_17 = arith.constant 0.000000e+00 : f32
    %24 = vector.broadcast %cst_17 : f32 to vector<64x128xf32>
    %25 = arith.maximumf %23, %24 : vector<64x128xf32>
    %c0_18 = arith.constant 0 : index
    %c0_19 = arith.constant 0 : index
    %26 = vector.load %arg13[%c0_18, %c0_19] : memref<8x128xf32, #tpu.memory_space<vmem>>, vector<8x128xf32>
    %27 = vector.shape_cast %25 : vector<64x128xf32> to vector<8x8x128xf32>
    %cst_20 = arith.constant dense<0.000000e+00> : vector<8x128xf32>
    %28 = vector.multi_reduction <add>, %27, %cst_20 [1] : vector<8x8x128xf32> to vector<8x128xf32>
    %29 = arith.addf %26, %28 : vector<8x128xf32>
    %c0_21 = arith.constant 0 : index
    %c0_22 = arith.constant 0 : index
    %30 = vector.load %arg13[%c0_21, %c0_22] : memref<8x128xf32, #tpu.memory_space<vmem>>, vector<8x128xf32>
    tpu.vector_store %arg13[%c0_21, %c0_22], %29 {strides = array<i32>} : memref<8x128xf32, #tpu.memory_space<vmem>>, vector<8x128xf32>,
    %c0_i32_23 = arith.constant 0 : i32
    %31 = arith.cmpi eq, %arg1, %c0_i32_23 : i32
    %32 = arith.extui %31 : i1 to i32
    %c0_i32_24 = arith.constant 0 : i32
    %33 = arith.cmpi ne, %32, %c0_i32_24 : i32
    scf.if %33 {
      %cst_25 = arith.constant 0.000000e+00 : f32
      %34 = vector.broadcast %cst_25 : f32 to vector<1x128xf32>
      %35 = arith.maximumf %4, %34 : vector<1x128xf32>
      %c0_26 = arith.constant 0 : index
      %c0_27 = arith.constant 0 : index
      %36 = vector.load %arg12[%c0_26, %c0_27] : memref<8x128xf32, #tpu.memory_space<vmem>>, vector<8x128xf32>
      %cst_28 = arith.constant 0.000000e+00 : f32
      %37 = vector.broadcast %cst_28 : f32 to vector<1x128xf32>
      %38 = arith.mulf %37, %35 : vector<1x128xf32>
      %39 = vector.broadcast %38 : vector<1x128xf32> to vector<8x128xf32>
      %40 = arith.subf %36, %39 : vector<8x128xf32>
      %cst_29 = arith.constant 1.250000e-01 : f32
      %41 = vector.broadcast %cst_29 : f32 to vector<8x128xf32>
      %42 = arith.mulf %40, %41 : vector<8x128xf32>
      %c0_30 = arith.constant 0 : index
      %c0_31 = arith.constant 0 : index
      %43 = vector.load %arg13[%c0_30, %c0_31] : memref<8x128xf32, #tpu.memory_space<vmem>>, vector<8x128xf32>
      %cst_32 = arith.constant 0.000000e+00 : f32
      %44 = vector.broadcast %cst_32 : f32 to vector<1x128xf32>
      %45 = arith.mulf %44, %35 : vector<1x128xf32>
      %46 = vector.broadcast %45 : vector<1x128xf32> to vector<8x128xf32>
      %47 = arith.subf %43, %46 : vector<8x128xf32>
      %cst_33 = arith.constant 1.250000e-01 : f32
      %48 = vector.broadcast %cst_33 : f32 to vector<8x128xf32>
      %49 = arith.mulf %47, %48 : vector<8x128xf32>
      %c0_34 = arith.constant 0 : index
      %c0_35 = arith.constant 0 : index
      %50 = vector.load %arg6[%c0_34, %c0_35] : memref<128x128xf32, #tpu.memory_space<vmem>>, vector<128x128xf32>
      %cst_36 = arith.constant dense<0.000000e+00> : vector<8x128xf32>
      %51 = tpu.matmul %42, %50, %cst_36 {dimension_numbers = #tpu.dot_dimension_numbers<[1], [0], [0], [1], [0, 0, 1, 1], [], []>} : vector<8x128xf32>, vector<128x128xf32>, vector<8x128xf32> -> vector<8x128xf32>
      %c0_37 = arith.constant 0 : index
      %c0_38 = arith.constant 0 : index
      %52 = vector.load %arg7[%c0_37, %c0_38] : memref<128x128xf32, #tpu.memory_space<vmem>>, vector<128x128xf32>
      %cst_39 = arith.constant dense<0.000000e+00> : vector<8x128xf32>
      %53 = tpu.matmul %49, %52, %cst_39 {dimension_numbers = #tpu.dot_dimension_numbers<[1], [0], [0], [1], [0, 0, 1, 1], [], []>} : vector<8x128xf32>, vector<128x128xf32>, vector<8x128xf32> -> vector<8x128xf32>
      %54 = arith.addf %51, %53 : vector<8x128xf32>
      %c0_40 = arith.constant 0 : index
      %c0_41 = arith.constant 0 : index
      %55 = vector.load %arg8[%c0_40, %c0_41] : memref<1x128xf32, #tpu.memory_space<vmem>>, vector<1x128xf32>
      %56 = vector.broadcast %55 : vector<1x128xf32> to vector<8x128xf32>
      %57 = arith.addf %54, %56 : vector<8x128xf32>
      %cst_42 = arith.constant 0.000000e+00 : f32
      %58 = vector.broadcast %cst_42 : f32 to vector<8x128xf32>
      %59 = arith.maximumf %57, %58 : vector<8x128xf32>
      %c0_43 = arith.constant 0 : index
      %c0_44 = arith.constant 0 : index
      %60 = vector.load %arg9[%c0_43, %c0_44] : memref<128x128xf32, #tpu.memory_space<vmem>>, vector<128x128xf32>
      %cst_45 = arith.constant dense<0.000000e+00> : vector<8x128xf32>
      %61 = tpu.matmul %59, %60, %cst_45 {dimension_numbers = #tpu.dot_dimension_numbers<[1], [0], [0], [1], [0, 0, 1, 1], [], []>} : vector<8x128xf32>, vector<128x128xf32>, vector<8x128xf32> -> vector<8x128xf32>
      %c0_46 = arith.constant 0 : index
      %c0_47 = arith.constant 0 : index
      %62 = memref.load %arg10[%c0_46, %c0_47] : memref<1x1xf32, #tpu.memory_space<smem>>
      %63 = vector.broadcast %62 : f32 to vector<8x128xf32>
      %64 = arith.addf %61, %63 : vector<8x128xf32>
      %65 = arith.negf %64 : vector<8x128xf32>
      %66 = math.exp %65 : vector<8x128xf32>
      %cst_48 = arith.constant 1.000000e+00 : f32
      %67 = vector.broadcast %cst_48 : f32 to vector<8x128xf32>
      %68 = arith.addf %67, %66 : vector<8x128xf32>
      %69 = arith.divf %67, %68 : vector<8x128xf32>
      %c0_49 = arith.constant 0 : index
      %c0_50 = arith.constant 0 : index
      %70 = vector.load %arg11[%c0_49, %c0_50] : memref<8x128xf32, #tpu.memory_space<vmem>>, vector<8x128xf32>
      tpu.vector_store %arg11[%c0_49, %c0_50], %69 {strides = array<i32>} : memref<8x128xf32, #tpu.memory_space<vmem>>, vector<8x128xf32>,
    } else {
    }
    return
  }
  func.func @transform_0(%arg0: i32, %arg1: i32) -> (i32, i32, i32) {
    %c0_i32 = arith.constant 0 : i32
    %c0_i32_0 = arith.constant 0 : i32
    return %arg0, %arg1, %c0_i32 : i32, i32, i32
  }
  func.func @transform_1(%arg0: i32, %arg1: i32) -> (i32, i32, i32) {
    %c0_i32 = arith.constant 0 : i32
    %c0_i32_0 = arith.constant 0 : i32
    return %arg0, %arg1, %c0_i32 : i32, i32, i32
  }
  func.func @transform_2(%arg0: i32, %arg1: i32) -> (i32, i32) {
    %c0_i32 = arith.constant 0 : i32
    %c0_i32_0 = arith.constant 0 : i32
    %c0_i32_1 = arith.constant 0 : i32
    return %c0_i32, %c0_i32_0 : i32, i32
  }
  func.func @transform_3(%arg0: i32, %arg1: i32) -> (i32, i32) {
    %c0_i32 = arith.constant 0 : i32
    %c0_i32_0 = arith.constant 0 : i32
    %c0_i32_1 = arith.constant 0 : i32
    return %c0_i32, %c0_i32_0 : i32, i32
  }
  func.func @transform_4(%arg0: i32, %arg1: i32) -> (i32, i32) {
    %c0_i32 = arith.constant 0 : i32
    %c0_i32_0 = arith.constant 0 : i32
    %c0_i32_1 = arith.constant 0 : i32
    return %c0_i32, %c0_i32_0 : i32, i32
  }
  func.func @transform_5(%arg0: i32, %arg1: i32) -> (i32, i32) {
    %c0_i32 = arith.constant 0 : i32
    %c0_i32_0 = arith.constant 0 : i32
    %c0_i32_1 = arith.constant 0 : i32
    return %c0_i32, %c0_i32_0 : i32, i32
  }
  func.func @transform_6(%arg0: i32, %arg1: i32) -> (i32, i32) {
    %c0_i32 = arith.constant 0 : i32
    %c0_i32_0 = arith.constant 0 : i32
    %c0_i32_1 = arith.constant 0 : i32
    return %c0_i32, %c0_i32_0 : i32, i32
  }
  func.func @transform_7(%arg0: i32, %arg1: i32) -> (i32, i32) {
    %c0_i32 = arith.constant 0 : i32
    %c0_i32_0 = arith.constant 0 : i32
    %c0_i32_1 = arith.constant 0 : i32
    return %c0_i32, %c0_i32_0 : i32, i32
  }
  func.func @transform_8(%arg0: i32, %arg1: i32) -> (i32, i32) {
    %c0_i32 = arith.constant 0 : i32
    %c0_i32_0 = arith.constant 0 : i32
    %c0_i32_1 = arith.constant 0 : i32
    return %c0_i32, %c0_i32_0 : i32, i32
  }
  func.func @transform_9(%arg0: i32, %arg1: i32) -> (i32, i32) {
    %c0_i32 = arith.constant 0 : i32
    %c0_i32_0 = arith.constant 0 : i32
    return %arg0, %c0_i32 : i32, i32
  }
}

</mosaic_0001>

<bundles_post_ra>
// kernel: tpu_custom_call.1
= control target key start
LH: loop header
LB: loop body
LE: loop exit
PB: predicated region body
PF: predicated region fallthrough
CT: control target
= control target key end

     0   :  { %15 = vsyncpa [#allocation6], 0  ;;  %s1527_s0 = inlined_call_operand.hbm [shape: f32[8,8,32], index: 0, kind: input, shape index: {}]   ;;  %s1528_s1 = inlined_call_operand.hbm [shape: f32[8,8,32], index: 1, kind: input, shape index: {}]   ;;  %s1529_s2 = inlined_call_operand.hbm [shape: bf16[32,128], index: 2, kind: input, shape index: {}]   ;;  %s1530_s3 = inlined_call_operand.vmem [shape: f32[1,128], index: 3, kind: input, shape index: {}]   ;;  %s1531_s4 = inlined_call_operand.hbm [shape: f32[128,128], index: 4, kind: input, shape index: {}]   ;;  %s1532_s5 = inlined_call_operand.hbm [shape: f32[128,128], index: 5, kind: input, shape index: {}]   ;;  %s1533_s6 = inlined_call_operand.vmem [shape: f32[1,128], index: 6, kind: input, shape index: {}]   ;;  %s1534_s7 = inlined_call_operand.hbm [shape: f32[128,128], index: 7, kind: input, shape index: {}]   ;;  %s1535_s8 = inlined_call_operand.<no memory space> [shape: f32[1,1], index: 8, kind: input, shape index: {}]   ;;  %s1536_s9 = inlined_call_operand.hbm [shape: f32[8,128], index: 9, kind: output, shape index: {}]  }
   0x1   :  { %16 = vsyncpa [#allocation9], 0 }
   0x2   :  { %17 = vsyncpa [#allocation12], 0 }
   0x3   :  { %18 = vsyncpa [#allocation15], 0 }
   0x4   :  { %19 = vsyncpa [#allocation7], 0  ;;  %s1253_s30 = smov [#allocation8]   ;;  %s1254_s11 = smov [#allocation11]  }
   0x5   :  { %s37_s10 = sshll.u32 %s1253_s30, 4  ;;  %s63_s12 = sshll.u32 %s1254_s11, 4  ;;  %s38_s10 = int_to_ptr.vmem [resolvable:$true] %s37_s10  ;;  %s1317_s12 = int_to_ptr.vmem [resolvable:$true] %s63_s12 }
   0x6   :  { %s1089_s15 = scalar_lea.hbm %s1528_s1, 1024 }
   0x7   :  { %p1090_p0 = scmp.ne.s32.totalorder %s1528_s1, %s1089_s15  ;;  %p1093_p1 = scmp.lt.u32.totalorder %s1089_s15, %s1528_s1 }
   0x9   :  { %p1095_p2 = pnand %p1093_p1, %p1090_p0 }
   0xb   :  { %1098 = shalt.err (!%p1095_p2)
}
   0xc   :  { %s1099_s20 = scalar_lea.vmem %s38_s10, 1024  ;;  %p1104_p4 = scmp.lt.s32.totalorder %s38_s10, %s38_s10 }
   0xd   :  { %p1100_p3 = scmp.ne.s32.totalorder %s38_s10, %s1099_s20  ;;  %p1105_p5 = scmp.lt.s32.totalorder %s1099_s20, %s1099_s20 }
   0xf   :  { %p1106_p6 = por %p1105_p5, %p1104_p4 }
  0x11   :  { %p1107_p7 = pnand %p1106_p6, %p1100_p3 }
  0x13   :  { %1110 = shalt.err (!%p1107_p7)
}
  0x14   :  { %s1255_s21 = smov 128   ;;  %s1256_s22 = smov 8  }
  0x15   :  { %43 = dma.hbm_to_vmem [thread:$0]  %s1528_s1, 1024, %s38_s10, [#allocation9], %s1255_s21, %s1255_s21, %s1256_s22  }
  0x16   :  { %s1111_s27 = scalar_lea.hbm %s1531_s4, 2048 }
  0x17   :  { %p1112_p8 = scmp.ne.s32.totalorder %s1531_s4, %s1111_s27  ;;  %p1115_p9 = scmp.lt.u32.totalorder %s1111_s27, %s1531_s4 }
  0x19   :  { %p1117_p10 = pnand %p1115_p9, %p1112_p8 }
  0x1b   :  { %1120 = shalt.err (!%p1117_p10)
}
  0x1c   :  { %s1121_s13 = scalar_lea.vmem %s1317_s12, 2048  ;;  %p1126_p12 = scmp.lt.s32.totalorder %s1317_s12, %s1317_s12 }
  0x1d   :  { %p1122_p11 = scmp.ne.s32.totalorder %s1317_s12, %s1121_s13  ;;  %p1127_p13 = scmp.lt.s32.totalorder %s1121_s13, %s1121_s13 }
  0x1f   :  { %p1128_p0 = por %p1127_p13, %p1126_p12 }
  0x21   :  { %p1129_p1 = pnand %p1128_p0, %p1122_p11 }
  0x23   :  { %1132 = shalt.err (!%p1129_p1)
}
  0x24   :  { %69 = dma.hbm_to_vmem [thread:$0]  %s1531_s4, 2048, %s1317_s12, [#allocation12], %s1255_s21, %s1255_s21, %s1256_s22  }
  0x25   :  { %s1257_s14 = smov [#allocation5]   ;;  %s1258_s16 = smov [#allocation10]  }
  0x26   :  { %s25_s15 = sshll.u32 %s1257_s14, 4  ;;  %s49_s17 = sshll.u32 %s1258_s16, 4  ;;  %s26_s15 = int_to_ptr.vmem [resolvable:$true] %s25_s15  ;;  %s1354_s17 = int_to_ptr.vmem [resolvable:$true] %s49_s17 }
  0x27   :  { %s1133_s20 = scalar_lea.hbm %s1527_s0, 1024 }
  0x28   :  { %p1134_p2 = scmp.ne.s32.totalorder %s1527_s0, %s1133_s20  ;;  %p1137_p3 = scmp.lt.u32.totalorder %s1133_s20, %s1527_s0 }
  0x2a   :  { %p1139_p4 = pnand %p1137_p3, %p1134_p2 }
  0x2c   :  { %1142 = shalt.err (!%p1139_p4)
}
  0x2d   :  { %s1143_s4 = scalar_lea.vmem %s26_s15, 1024  ;;  %p1148_p6 = scmp.lt.s32.totalorder %s26_s15, %s26_s15 }
  0x2e   :  { %p1144_p5 = scmp.ne.s32.totalorder %s26_s15, %s1143_s4  ;;  %p1149_p7 = scmp.lt.s32.totalorder %s1143_s4, %s1143_s4 }
  0x30   :  { %p1150_p8 = por %p1149_p7, %p1148_p6 }
  0x32   :  { %p1151_p9 = pnand %p1150_p8, %p1144_p5 }
  0x34   :  { %1154 = shalt.err (!%p1151_p9)
}
  0x35   :  { %31 = dma.hbm_to_vmem [thread:$0]  %s1527_s0, 1024, %s26_s15, [#allocation6], %s1255_s21, %s1255_s21, %s1256_s22  }
  0x36   :  { %s1155_s30 = scalar_lea.hbm %s1529_s2, 256 }
  0x37   :  { %p1156_p10 = scmp.ne.s32.totalorder %s1529_s2, %s1155_s30  ;;  %p1159_p11 = scmp.lt.u32.totalorder %s1155_s30, %s1529_s2 }
  0x39   :  { %p1161_p12 = pnand %p1159_p11, %p1156_p10 }
  0x3b   :  { %1164 = shalt.err (!%p1161_p12)
}
  0x3c   :  { %s1165_s14 = scalar_lea.vmem %s1354_s17, 256  ;;  %p1170_p0 = scmp.lt.s32.totalorder %s1354_s17, %s1354_s17 }
  0x3d   :  { %p1166_p13 = scmp.ne.s32.totalorder %s1354_s17, %s1165_s14  ;;  %p1171_p1 = scmp.lt.s32.totalorder %s1165_s14, %s1165_s14 }
  0x3f   :  { %p1172_p2 = por %p1171_p1, %p1170_p0 }
  0x41   :  { %p1173_p3 = pnand %p1172_p2, %p1166_p13 }
  0x43   :  { %1176 = shalt.err (!%p1173_p3)
}
  0x44   :  { %s1259_s0 = smov 64   ;;  %s1260_s15 = smov 4  }
  0x45   :  { %55 = dma.hbm_to_vmem [thread:$0]  %s1529_s2, 256, %s1354_s17, [#allocation9], %s1259_s0, %s1259_s0, %s1260_s15  }
  0x46   :  { %s1261_s19 = smov [#allocation13]   ;;  %s1262_s23 = smov [#allocation14]  }
  0x47   :  { %s75_s20 = sshll.u32 %s1261_s19, 4  ;;  %s89_s24 = sshll.u32 %s1262_s23, 4  ;;  %s76_s20 = int_to_ptr.vmem [resolvable:$true] %s75_s20  ;;  %s1388_s24 = int_to_ptr.vmem [resolvable:$true] %s89_s24 }
  0x48   :  { %s1177_s4 = scalar_lea.hbm %s1532_s5, 2048 }
  0x49   :  { %p1178_p4 = scmp.ne.s32.totalorder %s1532_s5, %s1177_s4  ;;  %p1181_p5 = scmp.lt.u32.totalorder %s1177_s4, %s1532_s5 }
  0x4b   :  { %p1183_p6 = pnand %p1181_p5, %p1178_p4 }
  0x4d   :  { %1186 = shalt.err (!%p1183_p6)
}
  0x4e   :  { %s1187_s2 = scalar_lea.vmem %s76_s20, 2048  ;;  %p1192_p8 = scmp.lt.s32.totalorder %s76_s20, %s76_s20 }
  0x4f   :  { %p1188_p7 = scmp.ne.s32.totalorder %s76_s20, %s1187_s2  ;;  %p1193_p9 = scmp.lt.s32.totalorder %s1187_s2, %s1187_s2 }
  0x51   :  { %p1194_p10 = por %p1193_p9, %p1192_p8 }
  0x53   :  { %p1195_p11 = pnand %p1194_p10, %p1188_p7 }
  0x55   :  { %1198 = shalt.err (!%p1195_p11)
}
  0x56   :  { %81 = dma.hbm_to_vmem [thread:$0]  %s1532_s5, 2048, %s76_s20, [#allocation12], %s1255_s21, %s1255_s21, %s1256_s22  }
  0x57   :  { %s1199_s1 = scalar_lea.hbm %s1534_s7, 2048 }
  0x58   :  { %p1200_p12 = scmp.ne.s32.totalorder %s1534_s7, %s1199_s1  ;;  %p1203_p13 = scmp.lt.u32.totalorder %s1199_s1, %s1534_s7 }
  0x5a   :  { %p1205_p0 = pnand %p1203_p13, %p1200_p12 }
  0x5c   :  { %1208 = shalt.err (!%p1205_p0)
}
  0x5d   :  { %s1209_s16 = scalar_lea.vmem %s1388_s24, 2048  ;;  %p1214_p2 = scmp.lt.s32.totalorder %s1388_s24, %s1388_s24 }
  0x5e   :  { %p1210_p1 = scmp.ne.s32.totalorder %s1388_s24, %s1209_s16  ;;  %p1215_p3 = scmp.lt.s32.totalorder %s1209_s16, %s1209_s16 }
  0x60   :  { %p1216_p4 = por %p1215_p3, %p1214_p2 }
  0x62   :  { %p1217_p5 = pnand %p1216_p4, %p1210_p1 }
  0x64   :  { %1220 = shalt.err (!%p1217_p5)
}
  0x65   :  { %95 = dma.hbm_to_vmem [thread:$0]  %s1534_s7, 2048, %s1388_s24, [#allocation15], %s1255_s21, %s1255_s21, %s1256_s22  }
  0x66   :  { %1243 = dma.done.wait [#allocation6], 1024  }
  0x67   :  { %1244 = vsyncadd [#allocation6], 4294966272 }
  0x68   :  { %1245 = dma.done.wait [#allocation9], 1280  }
  0x69   :  { %1246 = vsyncadd [#allocation9], 4294966016 }
  0x6a   :  { %1247 = dma.done.wait [#allocation12], 4096  }
  0x6b   :  { %1248 = vsyncadd [#allocation12], 4294963200 }
  0x6c   :  { %1249 = dma.done.wait [#allocation15], 2048  }
  0x6d   :  { %1250 = vsyncadd [#allocation15], 4294965248  ;;  %v1083_v0 = vld [vmem:[#allocation10] sm:$0xff]   ;;  %v1084_v1 = vld [vmem:[#allocation10 + $0x8] sm:$0xff]   ;;  %vm158_vm0 = vcmask 261120   ;;  %v1263_v29 = vmov 0.0|0.0  }
  0x6e   :  { %868 = vmatprep.subr.bf16.mxu1 %v1083_v0  ;;  %v128_v2 = vld [vmem:[#allocation5] sm:$0xff]  ;;  %v129_v3 = vld [vmem:[#allocation5 + $0x8] sm:$0xff]  ;;  %v130_v5 = vld [vmem:[#allocation5 + $0x10] sm:$0xff]  ;;  %997 = vmatprep.subr.bf16.mxu0 %v1263_v29  ;;  %vm1264_vm1 = vmmov 0   ;;  %vm301_vm2 = vcmask 1041409   ;;  %vm303_vm3 = vcmask 1042434  }
  0x6f   :  { %869 = vmatpush3.bf16.msra.mxu1 %v1083_v0  ;;  %v136_v4 = vpack.c.bf16 %v129_v3, %v128_v2  ;;  %v131_v6 = vld [vmem:[#allocation5 + $0x18] sm:$0xff]  ;;  %v132_v7 = vld [vmem:[#allocation5 + $0x20] sm:$0xff]  ;;  %v133_v8 = vld [vmem:[#allocation5 + $0x28] sm:$0xff]  ;;  %vm305_vm4 = vcmask 1043459   ;;  %vm307_vm5 = vcmask 1044484   ;;  %vm309_vm6 = vcmask 1045509  }
  0x70   :  { %870 = vmatprep.subr.bf16.mxu1 %v1084_v1  ;;  %v137_v9 = vpack.c.bf16 %v131_v6, %v130_v5  ;;  %v138_v10 = vpack.c.bf16 %v133_v8, %v132_v7  ;;  %v134_v11 = vld [vmem:[#allocation5 + $0x30] sm:$0xff]  ;;  %v135_v12 = vld [vmem:[#allocation5 + $0x38] sm:$0xff]  ;;  %v318_v13 = vld [vmem:[#allocation8] sm:$0xff]  ;;  %vm311_vm7 = vcmask 1046534   ;;  %vm313_vm8 = vcmask 1047559   ;;  %s1266_s23 = smov [#allocation16]  }
  0x71   :  { %872 = vmatprep.mubr.msk.bf16.mxu1 %vm158_vm0, %v136_v4  ;;  %v319_v14 = vld [vmem:[#allocation8 + $0x8] sm:$0xff]  ;;  %v139_v15 = vpack.c.bf16 %v135_v12, %v134_v11  ;;  %v320_v17 = vld [vmem:[#allocation8 + $0x10] sm:$0xff]  ;;  %v321_v18 = vld [vmem:[#allocation8 + $0x18] sm:$0xff]  ;;  %v141_v12 = vlaneseq  ;;  %s781_s24 = sshll.u32 %s1266_s23, 4  ;;  %s782_s24 = int_to_ptr.vmem [resolvable:$true] %s781_s24 }
  0x72   :  { %v326_v16 = vpack.c.bf16 %v319_v14, %v318_v13  ;;  %v322_v19 = vld [vmem:[#allocation8 + $0x20] sm:$0xff]  ;;  %v323_v20 = vld [vmem:[#allocation8 + $0x28] sm:$0xff]  ;;  %v327_v21 = vpack.c.bf16 %v321_v18, %v320_v17  ;;  %v324_v23 = vld [vmem:[#allocation8 + $0x30] sm:$0xff]  ;;  %p1226_p7 = scmp.lt.s32.totalorder %s782_s24, %s782_s24 }
  0x73   :  { %871 = vmatpush3.bf16.msra.mxu1 %v1084_v1  ;;  %v328_v22 = vpack.c.bf16 %v323_v20, %v322_v19  ;;  %v325_v24 = vld [vmem:[#allocation8 + $0x38] sm:$0xff]  ;;  %v499_v26 = vld [vmem:[#allocation11] sm:$0xff]  ;;  %v501_v30 = vld [vmem:[#allocation11 + $0x10] sm:$0xff]  ;;  %v1454_v13 = vshrl.u32 %v141_v12, 7 }
  0x74   :  { %880 = vmatprep.subr.bf16.mxu1 %v1083_v0  ;;  %v329_v25 = vpack.c.bf16 %v325_v24, %v324_v23  ;;  %v500_v27 = vld [vmem:[#allocation11 + $0x8] sm:$0xff]  ;;  %v502_v31 = vld [vmem:[#allocation11 + $0x18] sm:$0xff]  ;;  %v503_v33 = vld [vmem:[#allocation11 + $0x20] sm:$0xff] }
  0x75   :  { %v1022_v28 = vpack.c.bf16 %v500_v27, %v499_v26  ;;  %v1025_v32 = vpack.c.bf16 %v502_v31, %v501_v30  ;;  %v504_v34 = vld [vmem:[#allocation11 + $0x28] sm:$0xff]  ;;  %v505_v36 = vld [vmem:[#allocation11 + $0x30] sm:$0xff]  ;;  %v506_v37 = vld [vmem:[#allocation11 + $0x38] sm:$0xff]  ;;  %v143_v14 = vsub.s32 0, %v1454_v13 }
  0x76   :  { %873 = vmatmul.mubr.msk.bf16.vlgmr.msra.gmra.mrb[0].mxu1 %vm158_vm0, %v137_v9  ;;  %v1028_v35 = vpack.c.bf16 %v504_v34, %v503_v33  ;;  %v1031_v38 = vpack.c.bf16 %v506_v37, %v505_v36  ;;  %v515_v39 = vld [vmem:[#allocation13] sm:$0xff]  ;;  %v516_v40 = vld [vmem:[#allocation13 + $0x8] sm:$0xff]  ;;  %v517_v45 = vld [vmem:[#allocation13 + $0x10] sm:$0xff] }
  0x77   :  { %881 = vmatpush3.bf16.msra.mxu1 %v1083_v0  ;;  %876 = vmatprep.mubr.msk.bf16.mxu1 %vm158_vm0, %v138_v10  ;;  %v507_v41 = vld [vmem:[#allocation11 + $0x40] sm:$0xff]  ;;  %v998_v42 = vpack.c.bf16 %v516_v40, %v515_v39  ;;  %v508_v43 = vld [vmem:[#allocation11 + $0x48] sm:$0xff]  ;;  %v518_v46 = vld [vmem:[#allocation13 + $0x18] sm:$0xff] }
  0x78   :  { %882 = vmatprep.subr.bf16.mxu1 %v1084_v1  ;;  %v1034_v44 = vpack.c.bf16 %v508_v43, %v507_v41  ;;  %v509_v47 = vld [vmem:[#allocation11 + $0x50] sm:$0xff]  ;;  %v1001_v48 = vpack.c.bf16 %v518_v46, %v517_v45  ;;  %v510_v49 = vld [vmem:[#allocation11 + $0x58] sm:$0xff]  ;;  %v519_v51 = vld [vmem:[#allocation13 + $0x20] sm:$0xff] }
  0x79   :  { %999 = vmatpush3.bf16.msra.mxu0 %v998_v42  ;;  %v1037_v50 = vpack.c.bf16 %v510_v49, %v509_v47  ;;  %v520_v52 = vld [vmem:[#allocation13 + $0x28] sm:$0xff]  ;;  %v511_v53 = vld [vmem:[#allocation11 + $0x60] sm:$0xff]  ;;  %v521_v57 = vld [vmem:[#allocation13 + $0x30] sm:$0xff] }
  0x7a   :  { %1000 = vmatprep.subr.bf16.mxu0 %v1263_v29  ;;  %v1004_v54 = vpack.c.bf16 %v520_v52, %v519_v51  ;;  %v512_v55 = vld [vmem:[#allocation11 + $0x68] sm:$0xff]  ;;  %v522_v58 = vld [vmem:[#allocation13 + $0x38] sm:$0xff]  ;;  %v513_v59 = vld [vmem:[#allocation11 + $0x70] sm:$0xff] }
  0x7b   :  { %883 = vmatpush3.bf16.msra.mxu1 %v1084_v1  ;;  %v1040_v56 = vpack.c.bf16 %v512_v55, %v511_v53  ;;  %v1007_v60 = vpack.c.bf16 %v522_v58, %v521_v57  ;;  %v514_v61 = vld [vmem:[#allocation11 + $0x78] sm:$0xff]  ;;  %v523_v63 = vld [vmem:[#allocation13 + $0x40] sm:$0xff]  ;;  %v524_v0 = vld [vmem:[#allocation13 + $0x48] sm:$0xff]  ;;  %v1265_v1 = vmov 0.0  }
  0x7c   :  { %1021 = vmatprep.subr.bf16.mxu1 %v1263_v29  ;;  %v1043_v62 = vpack.c.bf16 %v514_v61, %v513_v59  ;;  %v1010_v2 = vpack.c.bf16 %v524_v0, %v523_v63  ;;  %924 = vmatprep.mubr.msk.f32.mxu0 %vm1264_vm1, %v1265_v1  ;;  %v525_v3 = vld [vmem:[#allocation13 + $0x50] sm:$0xff]  ;;  %v526_v4 = vld [vmem:[#allocation13 + $0x58] sm:$0xff]  ;;  %v527_v6 = vld [vmem:[#allocation13 + $0x60] sm:$0xff] }
  0x7d   :  { %1002 = vmatpush3.bf16.msra.mxu0 %v1001_v48  ;;  %v1013_v5 = vpack.c.bf16 %v526_v4, %v525_v3  ;;  %v528_v7 = vld [vmem:[#allocation13 + $0x68] sm:$0xff]  ;;  %v529_v8 = vld [vmem:[#allocation13 + $0x70] sm:$0xff]  ;;  %v530_v10 = vld [vmem:[#allocation13 + $0x78] sm:$0xff] }
  0x7e   :  { %877 = vmatmul.mubr.msk.bf16.gmra.mrb[4].mxu1 %vm158_vm0, %v139_v15  ;;  %1003 = vmatprep.subr.bf16.mxu0 %v1263_v29  ;;  %v1016_v9 = vpack.c.bf16 %v528_v7, %v527_v6  ;;  %v1019_v11 = vpack.c.bf16 %v530_v10, %v529_v8  ;;  %v1460_v15 = vld [vmem:[%s1530_s3] sm:$0x1] }
  0x7f   :  { %884 = vmatprep.mubr.msk.bf16.mxu1 %vm158_vm0, %v326_v16  ;;  %v1465_v16 = vrot.slane %v1460_v15, %v143_v14  ;;  %v485_v45 = vmax.f32 %v1460_v15, 0.0 }
  0x81   :  { %1005 = vmatpush3.bf16.msra.mxu0 %v1004_v54 }
  0x82   :  { %1006 = vmatprep.subr.bf16.mxu0 %v1263_v29 }
  0x85   :  { %1008 = vmatpush3.bf16.msra.mxu0 %v1007_v60 }
  0x86   :  { %885 = vmatmul.mubr.msk.bf16.vlgmr.msra.gmra.mrb[8].mxu1 %vm158_vm0, %v327_v21  ;;  %1009 = vmatprep.subr.bf16.mxu0 %v1263_v29 }
  0x87   :  { %888 = vmatprep.mubr.msk.bf16.mxu1 %vm158_vm0, %v328_v22  ;;  %1023 = vmatpush3.bf16.msra.mxu1 %v1022_v28 }
  0x88   :  { %1024 = vmatprep.subr.bf16.mxu1 %v1263_v29 }
  0x89   :  { %1011 = vmatpush3.bf16.msra.mxu0 %v1010_v2 }
  0x8a   :  { %1012 = vmatprep.subr.bf16.mxu0 %v1263_v29 }
  0x8b   :  { %1026 = vmatpush3.bf16.msra.mxu1 %v1025_v32 }
  0x8c   :  { %1027 = vmatprep.subr.bf16.mxu1 %v1263_v29 }
  0x8d   :  { %1014 = vmatpush3.bf16.msra.mxu0 %v1013_v5 }
  0x8e   :  { %889 = vmatmul.mubr.msk.bf16.gmra.mrb[12].mxu1 %vm158_vm0, %v329_v25  ;;  %1015 = vmatprep.subr.bf16.mxu0 %v1263_v29 }
  0x8f   :  { %1029 = vmatpush3.bf16.msra.mxu1 %v1028_v35  ;;  %959 = vmatprep.mubr.msk.f32.mxu1 %vm1264_vm1, %v1265_v1 }
  0x90   :  { %1030 = vmatprep.subr.bf16.mxu1 %v1263_v29 }
  0x91   :  { %1017 = vmatpush3.bf16.msra.mxu0 %v1016_v9 }
  0x92   :  { %1018 = vmatprep.subr.bf16.mxu0 %v1263_v29 }
  0x93   :  { %1032 = vmatpush3.bf16.msra.mxu1 %v1031_v38 }
  0x94   :  { %1033 = vmatprep.subr.bf16.mxu1 %v1263_v29 }
  0x95   :  { %1020 = vmatpush3.bf16.msra.mxu0 %v1019_v11 }
  0x96   :  { %1045 = vmatprep.subr.bf16.mxu0 %v1263_v29 }
  0x97   :  { %1035 = vmatpush3.bf16.msra.mxu1 %v1034_v44 }
  0x98   :  { %1036 = vmatprep.subr.bf16.mxu1 %v1263_v29 }
  0x9b   :  { %1038 = vmatpush3.bf16.msra.mxu1 %v1037_v50 }
  0x9c   :  { %1039 = vmatprep.subr.bf16.mxu1 %v1263_v29 }
  0x9f   :  { %1041 = vmatpush3.bf16.msra.mxu1 %v1040_v56 }
  0xa0   :  { %1042 = vmatprep.subr.bf16.mxu1 %v1263_v29 }
  0xa3   :  { %1044 = vmatpush3.bf16.msra.mxu1 %v1043_v62 }
 0x149   :  { %v874_v17 = vpop.f32.mrb[0].mxu1 }
 0x14a   :  { %v214_v18 = vadd.f32 %v874_v17, %v1465_v16  ;;  %v205_v19 = vpop.f32.mrb[1].mxu1 }
 0x14b   :  { %v206_v20 = vadd.f32 %v205_v19, %v1465_v16  ;;  %v875_v21 = vpop.f32.mrb[2].mxu1 }
 0x14c   :  { %v238_v22 = vmax.f32 %v214_v18, 0.0  ;;  %v217_v23 = vadd.f32 %v875_v21, %v1465_v16  ;;  %v208_v24 = vpop.f32.mrb[3].mxu1 }
 0x14d   :  { %v236_v25 = vmax.f32 %v206_v20, 0.0  ;;  %v209_v26 = vadd.f32 %v208_v24, %v1465_v16 }
 0x14e   :  { %v257_v27 = vrot.slane %v238_v22, 4  ;;  %v239_v28 = vmax.f32 %v217_v23, 0.0 }
 0x14f   :  { %v245_v30 = vrot.slane %v236_v25, 4  ;;  %v237_v31 = vmax.f32 %v209_v26, 0.0 }
 0x150   :  { %v258_v32 = vadd.f32 %v257_v27, %v238_v22  ;;  %v263_v33 = vrot.slane %v239_v28, 4 }
 0x151   :  { %v246_v34 = vadd.f32 %v245_v30, %v236_v25  ;;  %v251_v35 = vrot.slane %v237_v31, 4  ;;  %v878_v36 = vpop.f32.mrb[4].mxu1 }
 0x152   :  { %v259_v37 = vrot.slane %v258_v32, 2  ;;  %v264_v38 = vadd.f32 %v263_v33, %v239_v28  ;;  %v230_v39 = vadd.f32 %v878_v36, %v1465_v16  ;;  %v221_v40 = vpop.f32.mrb[5].mxu1 }
 0x153   :  { %v247_v41 = vrot.slane %v246_v34, 2  ;;  %v252_v42 = vadd.f32 %v251_v35, %v237_v31  ;;  %v222_v43 = vadd.f32 %v221_v40, %v1465_v16  ;;  %v879_v44 = vpop.f32.mrb[6].mxu1 }
 0x154   :  { %v260_v46 = vadd.f32 %v259_v37, %v258_v32  ;;  %v265_v47 = vrot.slane %v264_v38, 2  ;;  %v242_v48 = vmax.f32 %v230_v39, 0.0  ;;  %v233_v49 = vadd.f32 %v879_v44, %v1465_v16  ;;  %v224_v50 = vpop.f32.mrb[7].mxu1 }
 0x155   :  { %v248_v51 = vadd.f32 %v247_v41, %v246_v34  ;;  %v253_v52 = vrot.slane %v252_v42, 2  ;;  %v240_v53 = vmax.f32 %v222_v43, 0.0  ;;  %v225_v54 = vadd.f32 %v224_v50, %v1465_v16 }
 0x156   :  { %v261_v55 = vrot.slane %v260_v46, 1  ;;  %v266_v56 = vadd.f32 %v265_v47, %v264_v38  ;;  %v281_v57 = vrot.slane %v242_v48, 4  ;;  %v243_v58 = vmax.f32 %v233_v49, 0.0 }
 0x157   :  { %v249_v59 = vrot.slane %v248_v51, 1  ;;  %v254_v60 = vadd.f32 %v253_v52, %v252_v42  ;;  %v269_v61 = vrot.slane %v240_v53, 4  ;;  %v241_v62 = vmax.f32 %v225_v54, 0.0 }
 0x158   :  { %v262_v63 = vadd.f32 %v261_v55, %v260_v46  ;;  %v267_v0 = vrot.slane %v266_v56, 1  ;;  %v282_v2 = vadd.f32 %v281_v57, %v242_v48  ;;  %v287_v3 = vrot.slane %v243_v58, 4 }
 0x159   :  { %v250_v4 = vadd.f32 %v249_v59, %v248_v51  ;;  %v255_v5 = vrot.slane %v254_v60, 1  ;;  %v270_v6 = vadd.f32 %v269_v61, %v240_v53  ;;  %v275_v7 = vrot.slane %v241_v62, 4  ;;  %v886_v8 = vpop.f32.mrb[8].mxu1 }
 0x15a   :  { %v268_v9 = vadd.f32 %v267_v0, %v266_v56  ;;  %v283_v10 = vrot.slane %v282_v2, 2  ;;  %v288_v11 = vadd.f32 %v287_v3, %v243_v58  ;;  %v385_v12 = vadd.f32 %v886_v8, %v1465_v16  ;;  %v376_v15 = vpop.f32.mrb[9].mxu1 }
 0x15b   :  { %v256_v17 = vadd.f32 %v255_v5, %v254_v60  ;;  %v271_v18 = vrot.slane %v270_v6, 2  ;;  %v276_v19 = vadd.f32 %v275_v7, %v241_v62  ;;  %v377_v20 = vadd.f32 %v376_v15, %v1465_v16  ;;  %v887_v21 = vpop.f32.mrb[10].mxu1 }
 0x15c   :  { %v284_v22 = vadd.f32 %v283_v10, %v282_v2  ;;  %v289_v23 = vrot.slane %v288_v11, 2  ;;  %v409_v24 = vmax.f32 %v385_v12, 0.0  ;;  %v388_v25 = vadd.f32 %v887_v21, %v1465_v16  ;;  %v379_v26 = vpop.f32.mrb[11].mxu1 }
 0x15d   :  { %v302_v27 = vsel %vm301_vm2, %v256_v17, %v250_v4  ;;  %v272_v28 = vadd.f32 %v271_v18, %v270_v6  ;;  %v277_v30 = vrot.slane %v276_v19, 2  ;;  %v407_v31 = vmax.f32 %v377_v20, 0.0 }
 0x15e   :  { %v304_v32 = vsel %vm303_vm3, %v262_v63, %v302_v27  ;;  %v285_v33 = vrot.slane %v284_v22, 1  ;;  %v290_v34 = vadd.f32 %v289_v23, %v288_v11  ;;  %v428_v35 = vrot.slane %v409_v24, 4 }
 0x15f   :  { %v273_v36 = vrot.slane %v272_v28, 1  ;;  %v306_v37 = vsel %vm305_vm4, %v268_v9, %v304_v32  ;;  %v278_v38 = vadd.f32 %v277_v30, %v276_v19  ;;  %v416_v39 = vrot.slane %v407_v31, 4 }
 0x160   :  { %v429_v40 = vadd.f32 %v428_v35, %v409_v24  ;;  %v410_v41 = vmax.f32 %v388_v25, 0.0  ;;  %v487_v42 = vmul.f32 0.0, %v485_v45  ;;  %v380_v47 = vadd.f32 %v379_v26, %v1465_v16 }
 0x161   :  { %v274_v43 = vadd.f32 %v273_v36, %v272_v28  ;;  %v279_v44 = vrot.slane %v278_v38, 1  ;;  %v417_v46 = vadd.f32 %v416_v39, %v407_v31  ;;  %v890_v48 = vpop.f32.mrb[12].mxu1  ;;  %v286_v49 = vadd.f32 %v285_v33, %v284_v22 }
 0x162   :  { %v291_v50 = vrot.slane %v290_v34, 1  ;;  %v434_v51 = vrot.slane %v410_v41, 4  ;;  %v401_v52 = vadd.f32 %v890_v48, %v1465_v16  ;;  %v392_v53 = vpop.f32.mrb[13].mxu1  ;;  %v408_v57 = vmax.f32 %v380_v47, 0.0 }
 0x163   :  { %v308_v54 = vsel %vm307_vm5, %v274_v43, %v306_v37  ;;  %v280_v55 = vadd.f32 %v279_v44, %v278_v38  ;;  %v418_v56 = vrot.slane %v417_v46, 2  ;;  %v891_v58 = vpop.f32.mrb[14].mxu1  ;;  %v430_v59 = vrot.slane %v429_v40, 2 }
 0x164   :  { %v435_v45 = vadd.f32 %v434_v51, %v410_v41  ;;  %v413_v60 = vmax.f32 %v401_v52, 0.0  ;;  %v393_v61 = vadd.f32 %v392_v53, %v1465_v16  ;;  %v395_v62 = vpop.f32.mrb[15].mxu1  ;;  %v422_v0 = vrot.slane %v408_v57, 4 }
 0x165   :  { %v310_v63 = vsel %vm309_vm6, %v280_v55, %v308_v54  ;;  %v404_v2 = vadd.f32 %v891_v58, %v1465_v16  ;;  %v492_v3 = vrot.slane %v487_v42, %v143_v14  ;;  %v419_v5 = vadd.f32 %v418_v56, %v417_v46 }
 0x166   :  { %v312_v4 = vsel %vm311_vm7, %v286_v49, %v310_v63  ;;  %v436_v6 = vrot.slane %v435_v45, 2  ;;  %v452_v7 = vrot.slane %v413_v60, 4  ;;  %v292_v8 = vadd.f32 %v291_v50, %v290_v34 }
 0x167   :  { %v423_v9 = vadd.f32 %v422_v0, %v408_v57  ;;  %v411_v10 = vmax.f32 %v393_v61, 0.0  ;;  %v414_v11 = vmax.f32 %v404_v2, 0.0  ;;  %v431_v12 = vadd.f32 %v430_v59, %v429_v40  ;;  %v682_v2 = vld [vmem:[#allocation14 + $0x10] sm:$0xff] }
 0x168   :  { %v437_v15 = vadd.f32 %v436_v6, %v435_v45  ;;  %v453_v17 = vadd.f32 %v452_v7, %v413_v60  ;;  %v396_v18 = vadd.f32 %v395_v62, %v1465_v16  ;;  %v420_v22 = vrot.slane %v419_v5, 1  ;;  %v680_v45 = vld [vmem:[#allocation14] sm:$0xff]  ;;  %v681_v60 = vld [vmem:[#allocation14 + $0x8] sm:$0xff] }
 0x169   :  { %v424_v19 = vrot.slane %v423_v9, 2  ;;  %v440_v20 = vrot.slane %v411_v10, 4  ;;  %v458_v21 = vrot.slane %v414_v11, 4  ;;  %v314_v23 = vsel %vm313_vm8, %v292_v8, %v312_v4  ;;  %v683_v4 = vld [vmem:[#allocation14 + $0x18] sm:$0xff]  ;;  %v684_v6 = vld [vmem:[#allocation14 + $0x20] sm:$0xff]  ;;  %v685_v7 = vld [vmem:[#allocation14 + $0x28] sm:$0xff] }
 0x16a   :  { %v454_v13 = vrot.slane %v453_v17, 2  ;;  %v412_v14 = vmax.f32 %v396_v18, 0.0  ;;  %v494_v27 = vsub.f32 %v314_v23, %v492_v3  ;;  %v432_v28 = vrot.slane %v431_v12, 1 }
 0x16b   :  { %v425_v24 = vadd.f32 %v424_v19, %v423_v9  ;;  %v441_v25 = vadd.f32 %v440_v20, %v411_v10  ;;  %v459_v26 = vadd.f32 %v458_v21, %v414_v11  ;;  %v438_v30 = vrot.slane %v437_v15, 1  ;;  %v687_v9 = vld [vmem:[#allocation14 + $0x38] sm:$0xff]  ;;  %v688_v11 = vld [vmem:[#allocation14 + $0x40] sm:$0xff]  ;;  %v693_v20 = vld [vmem:[#allocation14 + $0x68] sm:$0xff] }
 0x16c   :  { %v446_v31 = vrot.slane %v412_v14, 4  ;;  %v495_v35 = vmul.f32 0.125, %v494_v27  ;;  %v421_v36 = vadd.f32 %v420_v22, %v419_v5  ;;  %v455_v38 = vadd.f32 %v454_v13, %v453_v17  ;;  %v691_v17 = vld [vmem:[#allocation14 + $0x58] sm:$0xff]  ;;  %v692_v19 = vld [vmem:[#allocation14 + $0x60] sm:$0xff]  ;;  %v694_v22 = vld [vmem:[#allocation14 + $0x70] sm:$0xff] }
 0x16d   :  { %v426_v32 = vrot.slane %v425_v24, 1  ;;  %v442_v33 = vrot.slane %v441_v25, 2  ;;  %v460_v34 = vrot.slane %v459_v26, 2  ;;  %v433_v40 = vadd.f32 %v432_v28, %v431_v12  ;;  %v689_v12 = vld [vmem:[#allocation14 + $0x48] sm:$0xff]  ;;  %v695_v13 = vld [vmem:[#allocation14 + $0x78] sm:$0xff] }
 0x16e   :  { %v447_v16 = vadd.f32 %v446_v31, %v412_v14  ;;  %960 = vmatmul.mubr.f32.vlgmr.msra.gmra.mrb[16].mxu1 %v495_v35  ;;  %v439_v43 = vadd.f32 %v438_v30, %v437_v15  ;;  %v456_v49 = vrot.slane %v455_v38, 1  ;;  %v1046_v63 = vpack.c.bf16 %v681_v60, %v680_v45 }
 0x16f   :  { %v427_v37 = vadd.f32 %v426_v32, %v425_v24  ;;  %v443_v39 = vadd.f32 %v442_v33, %v441_v25  ;;  %v461_v41 = vadd.f32 %v460_v34, %v459_v26  ;;  %v1049_v5 = vpack.c.bf16 %v683_v4, %v682_v2  ;;  %v803_v26 = vld [vmem:[%s1533_s6] ss:$0 sm:$0xff]  ;;  %s1221_s6 = scalar_lea.vmem %s782_s24, 128 }
 0x170   :  { %v448_v42 = vrot.slane %v447_v16, 2  ;;  %v457_v56 = vadd.f32 %v456_v49, %v455_v38  ;;  %v1052_v8 = vpack.c.bf16 %v685_v7, %v684_v6  ;;  %v1058_v15 = vpack.c.bf16 %v689_v12, %v688_v11  ;;  %p1222_p6 = scmp.ne.s32.totalorder %s782_s24, %s1221_s6  ;;  %p1227_p8 = scmp.lt.s32.totalorder %s1221_s6, %s1221_s6 }
 0x171   :  { %v472_v44 = vsel %vm301_vm2, %v427_v37, %v421_v36  ;;  %v444_v46 = vrot.slane %v443_v39, 1  ;;  %v462_v52 = vrot.slane %v461_v41, 1  ;;  %v1064_v21 = vpack.c.bf16 %v693_v20, %v692_v19 }
 0x172   :  { %v473_v47 = vsel %vm303_vm3, %v433_v40, %v472_v44  ;;  %v449_v48 = vadd.f32 %v448_v42, %v447_v16  ;;  %v1067_v14 = vpack.c.bf16 %v695_v13, %v694_v22  ;;  %p1228_p9 = por %p1227_p8, %p1226_p7 }
 0x173   :  { %v445_v50 = vadd.f32 %v444_v46, %v443_v39  ;;  %v474_v51 = vsel %vm305_vm4, %v439_v43, %v473_v47  ;;  %v463_v57 = vadd.f32 %v462_v52, %v461_v41 }
 0x174   :  { %v450_v53 = vrot.slane %v449_v48, 1  ;;  %p1229_p10 = pnand %p1228_p9, %p1222_p6 }
 0x175   :  { %v475_v54 = vsel %vm307_vm5, %v445_v50, %v474_v51 }
 0x176   :  { %v451_v55 = vadd.f32 %v450_v53, %v449_v48 }
 0x178   :  { %v476_v58 = vsel %vm309_vm6, %v451_v55, %v475_v54 }
 0x179   :  { %v477_v59 = vsel %vm311_vm7, %v457_v56, %v476_v58 }
 0x17a   :  { %v478_v61 = vsel %vm313_vm8, %v463_v57, %v477_v59 }
 0x17b   :  { %v497_v62 = vsub.f32 %v478_v61, %v492_v3  ;;  %v686_v3 = vld [vmem:[#allocation14 + $0x30] sm:$0xff] }
 0x17c   :  { %v1055_v10 = vpack.c.bf16 %v687_v9, %v686_v3 }
 0x17d   :  { %v498_v0 = vmul.f32 0.125, %v497_v62 }
 0x17f   :  { %925 = vmatmul.mubr.f32.vlgmr.msra.gmra.mrb[0].mxu0 %v498_v0 }
 0x180   :  { %1047 = vmatpush3.bf16.msra.mxu0 %v1046_v63  ;;  %994 = vmatprep.mubr.msk.f32.mxu0 %vm1264_vm1, %v1265_v1  ;;  %v690_v1 = vld [vmem:[#allocation14 + $0x50] sm:$0xff] }
 0x181   :  { %1048 = vmatprep.subr.bf16.mxu0 %v1263_v29  ;;  %v1061_v18 = vpack.c.bf16 %v691_v17, %v690_v1 }
 0x184   :  { %1050 = vmatpush3.bf16.msra.mxu0 %v1049_v5 }
 0x185   :  { %1051 = vmatprep.subr.bf16.mxu0 %v1263_v29 }
 0x188   :  { %1053 = vmatpush3.bf16.msra.mxu0 %v1052_v8 }
 0x189   :  { %1054 = vmatprep.subr.bf16.mxu0 %v1263_v29 }
 0x18c   :  { %1056 = vmatpush3.bf16.msra.mxu0 %v1055_v10 }
 0x18d   :  { %1057 = vmatprep.subr.bf16.mxu0 %v1263_v29 }
 0x190   :  { %1059 = vmatpush3.bf16.msra.mxu0 %v1058_v15 }
 0x191   :  { %1060 = vmatprep.subr.bf16.mxu0 %v1263_v29 }
 0x194   :  { %1062 = vmatpush3.bf16.msra.mxu0 %v1061_v18 }
 0x195   :  { %1063 = vmatprep.subr.bf16.mxu0 %v1263_v29 }
 0x198   :  { %1065 = vmatpush3.bf16.msra.mxu0 %v1064_v21 }
 0x199   :  { %1066 = vmatprep.subr.bf16.mxu0 %v1263_v29  ;;  %v697_v29 = vstv %s1535_s8 }
 0x19c   :  { %1068 = vmatpush3.bf16.msra.mxu0 %v1067_v14 }
 0x241   :  { %v667_v23 = vpop.f32.mrb[16].mxu1 }
 0x242   :  { %v961_v24 = vpop.f32.mrb[17].mxu1 }
 0x252   :  { %v597_v25 = vpop.f32.mrb[0].mxu0 }
 0x253   :  { %v668_v27 = vadd.f32 %v667_v23, %v597_v25  ;;  %v926_v28 = vpop.f32.mrb[1].mxu0 }
 0x255   :  { %v678_v30 = vadd.f32 %v803_v26, %v668_v27 }
 0x257   :  { %v679_v31 = vmax.f32 %v678_v30, 0.0 }
 0x259   :  { %995 = vmatmul.mubr.f32.vlgmr.msra.gmra.mrb[2].mxu0 %v679_v31 }
 0x32c   :  { %v764_v32 = vpop.f32.mrb[2].mxu0 }
 0x32d   :  { %v765_v33 = vadd.f32 %v764_v32, %v697_v29  ;;  %v996_v34 = vpop.f32.mrb[3].mxu0 }
 0x32f   :  { %v804_v35 = vmul.f32 -1.442695, %v765_v33 }
 0x331   :  { %1085 = vpow2.f32 %v804_v35 }
 0x33b   :  { %v1086_v16 = vpop.eup %1085 }
 0x33c   :  { %v771_v36 = vadd.f32 1.0, %v1086_v16 }
 0x33e   :  { %1087 = vrcp.f32 %v771_v36 }
 0x348   :  { %v1088_v37 = vpop.eup %1087 }
 0x349   :  { %774 = vst [vmem:[#allocation16] sm:$0xff] %v1088_v37 }
 0x34a   :  { %1232 = shalt.err (!%p1229_p10)
}
 0x34b   :  { %s1233_s26 = scalar_lea.hbm %s1536_s9, 128 }
 0x34c   :  { %p1234_p11 = scmp.ne.s32.totalorder %s1536_s9, %s1233_s26  ;;  %p1237_p12 = scmp.lt.u32.totalorder %s1233_s26, %s1536_s9 }
 0x34e   :  { %p1239_p13 = pnand %p1237_p12, %p1234_p11 }
 0x350   :  { %1242 = shalt.err (!%p1239_p13)
}
 0x351   :  { %784 = dma.vmem_to_hbm [thread:$0]  %s782_s24, 128, %s1536_s9, [#allocation7]  }
 0x352   :  { %1251 = dma.done.wait [#allocation7], 128  }
 0x353   :  { %1252 = vsyncadd [#allocation7], 4294967168 }
 0x354   :  { %788 = vsyncpa [#allocation6], 1 }
 0x355   :  { %789 = vsyncpa [#allocation9], 1 }
 0x356   :  { %790 = vsyncpa [#allocation12], 1 }
 0x357   :  { %791 = vsyncpa [#allocation15], 1 }
 0x358   :  { %792 = vsyncpa [#allocation7], 1 }

</bundles_post_ra>
